<compile_context>
chip_gen: v5e
topology: v5e:2x2
jax: 0.10.0
libtpu: 0.0.40
codegen_flags: <defaults>
</compile_context>

<pallas_src>
import functools

import jax
import jax.numpy as jnp
import numpy as np
from jax.experimental import pallas as pl
from jax.experimental.pallas import tpu as pltpu


def _rup(x, m):
    return (x + m - 1) // m * m


_ALIGN = 16       # bf16 sublane tile is (16, 128) -> 16-row-aligned slab blocks
_BIAS_ROWS = 16   # one 16-row block holding the 6 bias vectors


# ----------------------------------------------------------------------------
# Kernel: one grid step processes B_TILE states.
# ----------------------------------------------------------------------------
def _critic_kernel(region_ref, node_ref, bidx_ref, cnt_ref, slab_ref, out_ref, *,
                   offs, kdims):
    f32, bf16 = jnp.float32, jnp.bfloat16
    bt, maxb = bidx_ref.shape
    n_nodes, nd = node_ref.shape[1], node_ref.shape[2]
    p, rd = region_ref.shape[1], region_ref.shape[2]
    k_h, k_h2, k_hc = kdims["k_h"], kdims["k_h2"], kdims["k_hc"]

    # ---- carve the resident bf16 weight slab (static, 16-row-aligned slices) ----
    w1s = slab_ref[pl.ds(offs["w1s"], rd), :]          # [Rd,  LANE]
    w2s = slab_ref[pl.ds(offs["w2s"], k_h), :]         # [kH,  LANE]
    w1b = slab_ref[pl.ds(offs["w1b"], nd), :]          # [Nd,  LANE]
    w2b = slab_ref[pl.ds(offs["w2b"], k_h2), :]        # [kH2, LANE] (cols shifted by h2)
    w1v = slab_ref[pl.ds(offs["w1v"], k_hc), :]        # [kHc, LANE]
    w2v = slab_ref[pl.ds(offs["w2v"], k_h2), :]        # [kH2, LANE]
    bias = slab_ref[pl.ds(offs["bias"], _BIAS_ROWS), :].astype(f32)   # [16, LANE]
    b1s, b2s = bias[0:1, :], bias[1:2, :]
    b1b, b2b = bias[2:3, :], bias[3:4, :]               # b2b already shifted by h2 lanes
    b1v, b2v = bias[4:5, :], bias[5:6, :]

    # ---- per-state boundary counts ----
    cnt = cnt_ref[...]                                   # [bt, 1] int32
    flag = (cnt > 0).astype(f32)                         # [bt, 1]
    inv_n = flag / jnp.maximum(cnt.astype(f32), 1.0)     # [bt, 1]

    # ---- global-state branch: mean over regions, Linear+ReLU, Linear+ReLU ----
    region_mean = jnp.sum(region_ref[...].astype(f32), axis=1) * (1.0 / p)   # [bt, Rd]
    hs = jnp.dot(region_mean.astype(bf16), w1s, preferred_element_type=f32) + b1s
    hs = jnp.maximum(hs, 0.0)
    gs = jnp.dot(hs[:, :k_h].astype(bf16), w2s, preferred_element_type=f32) + b2s
    gs = jnp.maximum(gs, 0.0)                            # nonzero lanes: [0, h2)

    # ---- boundary branch: in-kernel duplicate-counting gather + mean ----
    idx = bidx_ref[...]                                  # [bt, maxb] int32 (zero padded)
    j_iota = jax.lax.broadcasted_iota(jnp.int32, (bt, maxb), 1)
    valid = (j_iota < cnt).astype(f32)                   # [bt, maxb]
    n_iota = jax.lax.broadcasted_iota(jnp.int32, (bt, maxb, n_nodes), 2)
    onehot = (idx[:, :, None] == n_iota).astype(f32) * valid[:, :, None]
    mask = jnp.sum(onehot, axis=1)                       # [bt, n_nodes] (counts dups)
    b_sum = jnp.sum(mask[:, :, None] * node_ref[...].astype(f32), axis=1)    # [bt, Nd]
    b_mean = b_sum * inv_n

    hb = jnp.dot(b_mean.astype(bf16), w1b, preferred_element_type=f32) + b1b
    hb = jnp.maximum(hb, 0.0)
    bi = jnp.dot(hb[:, :k_h2].astype(bf16), w2b, preferred_element_type=f32) + b2b
    bi = bi * flag                                        # torch: zeros when no boundary
    # nonzero lanes of bi: [h2, h2 + h4)  (disjoint from gs by construction)

    # ---- value head: concat == add (disjoint lanes) -> one fused K contraction ----
    comb = gs + bi                                        # [bt, LANE]
    hv = jnp.dot(comb[:, :k_hc].astype(bf16), w1v, preferred_element_type=f32) + b1v
    hv = jnp.maximum(hv, 0.0)
    val = jnp.dot(hv[:, :k_h2].astype(bf16), w2v, preferred_element_type=f32) + b2v
    out_ref[...] = val                                    # dense store; lane 0 = value


# ----------------------------------------------------------------------------
# Host-side parameter init / packing (packing is done once, off the hot path)
# ----------------------------------------------------------------------------
def _xavier_uniform(key, fan_in, fan_out):
    limit = (6.0 / (fan_in + fan_out)) ** 0.5
    return jax.random.uniform(key, (fan_in, fan_out), jnp.float32, -limit, limit)


def init_critic_params(key, node_dim, region_dim, hidden_dim):
    h, h2, h4 = hidden_dim, hidden_dim // 2, hidden_dim // 4
    ks = jax.random.split(key, 6)
    z = lambda n: jnp.zeros((n,), jnp.float32)
    return dict(
        w1s=_xavier_uniform(ks[0], region_dim, h),  b1s=z(h),
        w2s=_xavier_uniform(ks[1], h, h2),          b2s=z(h2),
        w1b=_xavier_uniform(ks[2], node_dim, h2),   b1b=z(h2),
        w2b=_xavier_uniform(ks[3], h2, h4),         b2b=z(h4),
        w1v=_xavier_uniform(ks[4], h2 + h4, h2),    b1v=z(h2),
        w2v=_xavier_uniform(ks[5], h2, 1),          b2v=z(1),
    )


def pack_critic_params(params, node_dim, region_dim, hidden_dim):
    """Pack all weights/biases into one bf16 (rows, LANE) slab.

    Blocks are zero-padded to LANE (>=128) lanes and _rup(rows, 16) rows; w2b/b2b
    are written into lane range [h2, h2+h4) so boundary_info comes out of its
    matmul already aligned with the un-split value-head weight w1v.
    """
    h, h2, h4 = hidden_dim, hidden_dim // 2, hidden_dim // 4
    lane = _rup(max(h, 128), 128)

    blocks = []

    def blk(name, w, col_off=0):
        r, c = w.shape
        buf = jnp.zeros((_rup(r, _ALIGN), lane), jnp.float32)
        buf = buf.at[:r, col_off:col_off + c].set(w.astype(jnp.float32))
        blocks.append((name, buf))

    blk("w1s", params["w1s"])
    blk("w2s", params["w2s"])
    blk("w1b", params["w1b"])
    blk("w2b", params["w2b"], col_off=h2)        # shift boundary_info into [h2, h2+h4)
    blk("w1v", params["w1v"])
    blk("w2v", params["w2v"])

    bias = jnp.zeros((_BIAS_ROWS, lane), jnp.float32)
    bias = bias.at[0, :h].set(params["b1s"])
    bias = bias.at[1, :h2].set(params["b2s"])
    bias = bias.at[2, :h2].set(params["b1b"])
    bias = bias.at[3, h2:h2 + h4].set(params["b2b"])     # shifted like w2b
    bias = bias.at[4, :h2].set(params["b1v"])
    bias = bias.at[5, :1].set(params["b2v"])
    blocks.append(("bias", bias))

    offs, row = {}, 0
    for name, buf in blocks:
        offs[name] = row
        row += buf.shape[0]
    slab = jnp.concatenate([b for _, b in blocks], axis=0).astype(jnp.bfloat16)

    dims = dict(lane=lane, offs=offs,
                kdims=dict(k_h=_rup(h, _ALIGN), k_h2=_rup(h2, _ALIGN),
                           k_hc=_rup(h2 + h4, _ALIGN)))
    return slab, dims


def pad_boundary_nodes(boundary_lists, max_boundary):
    """Pack per-state boundary index lists into a shape-stable [B, max_b] int32
    array (zero padded) plus per-state counts [B, 1] int32."""
    B = len(boundary_lists)
    idx = np.zeros((B, max_boundary), np.int32)
    cnt = np.zeros((B, 1), np.int32)
    for i, bn in enumerate(boundary_lists):
        bn = np.asarray(bn, np.int32).reshape(-1)
        k = bn.shape[0]
        idx[i, :k] = bn
        cnt[i, 0] = k
    return jnp.asarray(idx), jnp.asarray(cnt)


# ----------------------------------------------------------------------------
# Forward wrapper (one pallas_call for the whole batch of states)
# ----------------------------------------------------------------------------
def critic_forward(slab, dims, node_embeddings, region_embeddings,
                   boundary_idx, boundary_cnt, *, b_tile=8):
    """node_embeddings [B,N,Nd], region_embeddings [B,P,Rd] (native dtype),
    boundary_idx [B,max_b] int32, boundary_cnt [B,1] int32 -> values [B]."""
    B, P, Rd = region_embeddings.shape
    _, N, Nd = node_embeddings.shape
    maxb = boundary_idx.shape[1]
    lane = dims["lane"]
    rows = slab.shape[0]
    assert B % b_tile == 0, "pad the batch to a multiple of b_tile (8)"

    kernel = functools.partial(_critic_kernel, offs=dims["offs"], kdims=dims["kdims"])
    out = pl.pallas_call(
        kernel,
        out_shape=jax.ShapeDtypeStruct((B, lane), jnp.float32),
        grid=(B // b_tile,),
        in_specs=[
            pl.BlockSpec((b_tile, P, Rd), lambda b: (b, 0, 0)),
            pl.BlockSpec((b_tile, N, Nd), lambda b: (b, 0, 0)),
            pl.BlockSpec((b_tile, maxb), lambda b: (b, 0)),
            pl.BlockSpec((b_tile, 1), lambda b: (b, 0)),
            # Weight slab: constant block index -> DMA'd once, VMEM-resident.
            pl.BlockSpec((rows, lane), lambda b: (0, 0)),
        ],
        out_specs=pl.BlockSpec((b_tile, lane), lambda b: (b, 0)),
        compiler_params=pltpu.CompilerParams(dimension_semantics=("parallel",)),
    )(region_embeddings, node_embeddings, boundary_idx, boundary_cnt, slab)
    return out[:, 0]


# ----------------------------------------------------------------------------
# Pure-JAX reference (mirrors the torch module, single state) for checking.
# ----------------------------------------------------------------------------
def critic_forward_ref(params, node_embeddings, region_embeddings, boundary_nodes,
                       hidden_dim):
    gs = jnp.mean(region_embeddings.astype(jnp.float32), axis=0, keepdims=True)
    gs = jnp.maximum(gs @ params["w1s"] + params["b1s"], 0.0)
    gs = jnp.maximum(gs @ params["w2s"] + params["b2s"], 0.0)
    if boundary_nodes.shape[0] > 0:
        bm = jnp.mean(node_embeddings[boundary_nodes].astype(jnp.float32),
                      axis=0, keepdims=True)
        bi = jnp.maximum(bm @ params["w1b"] + params["b1b"], 0.0)
        bi = bi @ params["w2b"] + params["b2b"]
    else:
        bi = jnp.zeros((1, hidden_dim // 4), jnp.float32)
    comb = jnp.concatenate([gs, bi], axis=1)
    hv = jnp.maximum(comb @ params["w1v"] + params["b1v"], 0.0)
    v = hv @ params["w2v"] + params["b2v"]
    return v[:, 0]


if __name__ == "__main__":
    node_dim, region_dim, hidden_dim = 16, 16, 32
    total_nodes, num_partitions = 24, 6
    B, MAX_BOUNDARY, B_TILE = 16, 16, 8

    key = jax.random.PRNGKey(0)
    k_node, k_region, k_bidx, k_param, k_bias = jax.random.split(key, 5)

    node_emb = jax.random.normal(k_node, (B, total_nodes, node_dim), jnp.float32)
    region_emb = jax.random.normal(k_region, (B, num_partitions, region_dim), jnp.float32)

    # Per-state boundary sets of varying size (state 0 is empty -> exercises the
    # torch zeros() branch; duplicates allowed and counted like torch's gather).
    idx_pool = np.asarray(jax.random.randint(k_bidx, (B, MAX_BOUNDARY), 0, total_nodes))
    counts = [(3 * i) % (MAX_BOUNDARY + 1) for i in range(B)]
    boundary_lists = [idx_pool[i, :counts[i]] for i in range(B)]
    boundary_idx, boundary_cnt = pad_boundary_nodes(boundary_lists, MAX_BOUNDARY)

    params = init_critic_params(k_param, node_dim, region_dim, hidden_dim)
    # The torch module zero-inits biases; use small nonzero biases here so the
    # kernel's bias handling / empty-boundary gating paths are actually tested.
    bias_keys = jax.random.split(k_bias, 6)
    for i, name in enumerate(("b1s", "b2s", "b1b", "b2b", "b1v", "b2v")):
        params[name] = 0.1 * jax.random.normal(bias_keys[i], params[name].shape,
                                               jnp.float32)

    slab, dims = pack_critic_params(params, node_dim, region_dim, hidden_dim)  # once

    values = critic_forward(slab, dims, node_emb, region_emb,
                            boundary_idx, boundary_cnt, b_tile=B_TILE)
    values = jax.block_until_ready(values)
    assert values.shape == (B,)

    # Reference with weights rounded through bf16 (the kernel's storage dtype);
    # accumulation is f32 in both, so only activation rounding differs.
    params_q = jax.tree_util.tree_map(
        lambda x: x.astype(jnp.bfloat16).astype(jnp.float32), params)
    refs = jnp.stack([
        critic_forward_ref(params_q, node_emb[i], region_emb[i],
                           jnp.asarray(boundary_lists[i], jnp.int32), hidden_dim)[0]
        for i in range(B)])
    assert jnp.allclose(values, refs, atol=2e-2, rtol=2e-2), (
        float(np.abs(np.asarray(values) - np.asarray(refs)).max()))

    print("KERNEL_OK")
</pallas_src>

<mosaic_0001>
module attributes {stable_mosaic.version = 11 : i64} {
  func.func @_critic_kernel(%arg0: i32, %arg1: memref<8x6x16xf32, #tpu.memory_space<vmem>>, %arg2: memref<8x24x16xf32, #tpu.memory_space<vmem>>, %arg3: memref<8x16xi32, #tpu.memory_space<vmem>>, %arg4: memref<8x1xi32, #tpu.memory_space<vmem>>, %arg5: memref<144x128xbf16, #tpu.memory_space<vmem>>, %arg6: memref<8x128xf32, #tpu.memory_space<vmem>>) attributes {dimension_semantics = [#tpu.dimension_semantics<parallel>], iteration_bounds = array<i64: 2>, scalar_prefetch = 0 : i64, scratch_operands = 0 : i64, tpu.core_type = #tpu.core_type<tc>, window_params = [{transform_indices = @transform_0, window_bounds = array<i64: 8, 6, 16>}, {transform_indices = @transform_1, window_bounds = array<i64: 8, 24, 16>}, {transform_indices = @transform_2, window_bounds = array<i64: 8, 16>}, {transform_indices = @transform_3, window_bounds = array<i64: 8, 1>}, {pipeline_mode = #tpu.pipeline_mode<synchronous>, transform_indices = @transform_4, window_bounds = array<i64: 144, 128>}, {transform_indices = @transform_5, window_bounds = array<i64: 8, 128>}]} {
    %c0 = arith.constant 0 : index
    %c0_0 = arith.constant 0 : index
    %0 = vector.load %arg5[%c0, %c0_0] : memref<144x128xbf16, #tpu.memory_space<vmem>>, vector<16x128xbf16>
    %c16 = arith.constant 16 : index
    %c0_1 = arith.constant 0 : index
    %1 = vector.load %arg5[%c16, %c0_1] : memref<144x128xbf16, #tpu.memory_space<vmem>>, vector<32x128xbf16>
    %c48 = arith.constant 48 : index
    %c0_2 = arith.constant 0 : index
    %2 = vector.load %arg5[%c48, %c0_2] : memref<144x128xbf16, #tpu.memory_space<vmem>>, vector<16x128xbf16>
    %c64 = arith.constant 64 : index
    %c0_3 = arith.constant 0 : index
    %3 = vector.load %arg5[%c64, %c0_3] : memref<144x128xbf16, #tpu.memory_space<vmem>>, vector<16x128xbf16>
    %c80 = arith.constant 80 : index
    %c0_4 = arith.constant 0 : index
    %4 = vector.load %arg5[%c80, %c0_4] : memref<144x128xbf16, #tpu.memory_space<vmem>>, vector<32x128xbf16>
    %c112 = arith.constant 112 : index
    %c0_5 = arith.constant 0 : index
    %5 = vector.load %arg5[%c112, %c0_5] : memref<144x128xbf16, #tpu.memory_space<vmem>>, vector<16x128xbf16>
    %c128 = arith.constant 128 : index
    %c0_6 = arith.constant 0 : index
    %6 = vector.load %arg5[%c128, %c0_6] : memref<144x128xbf16, #tpu.memory_space<vmem>>, vector<16x128xbf16>
    %7 = arith.extf %6 : vector<16x128xbf16> to vector<16x128xf32>
    %8 = vector.extract_strided_slice %7 {offsets = [0, 0], sizes = [1, 128], strides = [1, 1]} : vector<16x128xf32> to vector<1x128xf32>
    %9 = vector.extract_strided_slice %7 {offsets = [1, 0], sizes = [1, 128], strides = [1, 1]} : vector<16x128xf32> to vector<1x128xf32>
    %10 = vector.extract_strided_slice %7 {offsets = [2, 0], sizes = [1, 128], strides = [1, 1]} : vector<16x128xf32> to vector<1x128xf32>
    %11 = vector.extract_strided_slice %7 {offsets = [3, 0], sizes = [1, 128], strides = [1, 1]} : vector<16x128xf32> to vector<1x128xf32>
    %12 = vector.extract_strided_slice %7 {offsets = [4, 0], sizes = [1, 128], strides = [1, 1]} : vector<16x128xf32> to vector<1x128xf32>
    %13 = vector.extract_strided_slice %7 {offsets = [5, 0], sizes = [1, 128], strides = [1, 1]} : vector<16x128xf32> to vector<1x128xf32>
    %c0_7 = arith.constant 0 : index
    %c0_8 = arith.constant 0 : index
    %14 = vector.load %arg4[%c0_7, %c0_8] : memref<8x1xi32, #tpu.memory_space<vmem>>, vector<8x1xi32>
    %c0_i32 = arith.constant 0 : i32
    %15 = vector.broadcast %c0_i32 : i32 to vector<8x1xi32>
    %16 = arith.cmpi sgt, %14, %15 : vector<8x1xi32>
    %17 = arith.extui %16 : vector<8x1xi1> to vector<8x1xi32>
    %18 = arith.sitofp %17 : vector<8x1xi32> to vector<8x1xf32>
    %19 = arith.sitofp %14 : vector<8x1xi32> to vector<8x1xf32>
    %cst = arith.constant 1.000000e+00 : f32
    %20 = vector.broadcast %cst : f32 to vector<8x1xf32>
    %21 = arith.maximumf %19, %20 : vector<8x1xf32>
    %22 = arith.divf %18, %21 : vector<8x1xf32>
    %c0_9 = arith.constant 0 : index
    %c0_10 = arith.constant 0 : index
    %c0_11 = arith.constant 0 : index
    %23 = vector.load %arg1[%c0_9, %c0_10, %c0_11] : memref<8x6x16xf32, #tpu.memory_space<vmem>>, vector<8x6x16xf32>
    %cst_12 = arith.constant dense<0.000000e+00> : vector<8x16xf32>
    %24 = vector.multi_reduction <add>, %23, %cst_12 [1] : vector<8x6x16xf32> to vector<8x16xf32>
    %cst_13 = arith.constant 0.166666672 : f32
    %25 = vector.broadcast %cst_13 : f32 to vector<8x16xf32>
    %26 = arith.mulf %24, %25 : vector<8x16xf32>
    %27 = arith.truncf %26 : vector<8x16xf32> to vector<8x16xbf16>
    %cst_14 = arith.constant dense<0.000000e+00> : vector<8x128xf32>
    %28 = tpu.matmul %27, %0, %cst_14 {dimension_numbers = #tpu.dot_dimension_numbers<[1], [0], [0], [1], [0, 0, 1, 1], [], []>} : vector<8x16xbf16>, vector<16x128xbf16>, vector<8x128xf32> -> vector<8x128xf32>
    %29 = vector.broadcast %8 : vector<1x128xf32> to vector<8x128xf32>
    %30 = arith.addf %28, %29 : vector<8x128xf32>
    %cst_15 = arith.constant 0.000000e+00 : f32
    %31 = vector.broadcast %cst_15 : f32 to vector<8x128xf32>
    %32 = arith.maximumf %30, %31 : vector<8x128xf32>
    %33 = vector.extract_strided_slice %32 {offsets = [0, 0], sizes = [8, 32], strides = [1, 1]} : vector<8x128xf32> to vector<8x32xf32>
    %34 = arith.truncf %33 : vector<8x32xf32> to vector<8x32xbf16>
    %cst_16 = arith.constant dense<0.000000e+00> : vector<8x128xf32>
    %35 = tpu.matmul %34, %1, %cst_16 {dimension_numbers = #tpu.dot_dimension_numbers<[1], [0], [0], [1], [0, 0, 1, 1], [], []>} : vector<8x32xbf16>, vector<32x128xbf16>, vector<8x128xf32> -> vector<8x128xf32>
    %36 = vector.broadcast %9 : vector<1x128xf32> to vector<8x128xf32>
    %37 = arith.addf %35, %36 : vector<8x128xf32>
    %cst_17 = arith.constant 0.000000e+00 : f32
    %38 = vector.broadcast %cst_17 : f32 to vector<8x128xf32>
    %39 = arith.maximumf %37, %38 : vector<8x128xf32>
    %c0_18 = arith.constant 0 : index
    %c0_19 = arith.constant 0 : index
    %40 = vector.load %arg3[%c0_18, %c0_19] : memref<8x16xi32, #tpu.memory_space<vmem>>, vector<8x16xi32>
    %41 = tpu.iota {dimensions = array<i32: 1>} : vector<8x16xi32>
    %42 = vector.broadcast %14 : vector<8x1xi32> to vector<8x16xi32>
    %43 = arith.cmpi slt, %41, %42 : vector<8x16xi32>
    %44 = arith.extui %43 : vector<8x16xi1> to vector<8x16xi32>
    %45 = arith.sitofp %44 : vector<8x16xi32> to vector<8x16xf32>
    %46 = tpu.iota {dimensions = array<i32: 2>} : vector<8x16x24xi32>
    %47 = vector.shape_cast %40 : vector<8x16xi32> to vector<8x16x1xi32>
    %48 = vector.broadcast %47 : vector<8x16x1xi32> to vector<8x16x24xi32>
    %49 = arith.cmpi eq, %48, %46 : vector<8x16x24xi32>
    %50 = arith.extui %49 : vector<8x16x24xi1> to vector<8x16x24xi32>
    %51 = arith.sitofp %50 : vector<8x16x24xi32> to vector<8x16x24xf32>
    %52 = vector.shape_cast %45 : vector<8x16xf32> to vector<8x16x1xf32>
    %53 = vector.broadcast %52 : vector<8x16x1xf32> to vector<8x16x24xf32>
    %54 = arith.mulf %51, %53 : vector<8x16x24xf32>
    %cst_20 = arith.constant dense<0.000000e+00> : vector<8x24xf32>
    %55 = vector.multi_reduction <add>, %54, %cst_20 [1] : vector<8x16x24xf32> to vector<8x24xf32>
    %56 = vector.shape_cast %55 : vector<8x24xf32> to vector<8x24x1xf32>
    %c0_21 = arith.constant 0 : index
    %c0_22 = arith.constant 0 : index
    %c0_23 = arith.constant 0 : index
    %57 = vector.load %arg2[%c0_21, %c0_22, %c0_23] : memref<8x24x16xf32, #tpu.memory_space<vmem>>, vector<8x24x16xf32>
    %58 = vector.broadcast %56 : vector<8x24x1xf32> to vector<8x24x16xf32>
    %59 = arith.mulf %58, %57 : vector<8x24x16xf32>
    %cst_24 = arith.constant dense<0.000000e+00> : vector<8x16xf32>
    %60 = vector.multi_reduction <add>, %59, %cst_24 [1] : vector<8x24x16xf32> to vector<8x16xf32>
    %61 = vector.broadcast %22 : vector<8x1xf32> to vector<8x16xf32>
    %62 = arith.mulf %60, %61 : vector<8x16xf32>
    %63 = arith.truncf %62 : vector<8x16xf32> to vector<8x16xbf16>
    %cst_25 = arith.constant dense<0.000000e+00> : vector<8x128xf32>
    %64 = tpu.matmul %63, %2, %cst_25 {dimension_numbers = #tpu.dot_dimension_numbers<[1], [0], [0], [1], [0, 0, 1, 1], [], []>} : vector<8x16xbf16>, vector<16x128xbf16>, vector<8x128xf32> -> vector<8x128xf32>
    %65 = vector.broadcast %10 : vector<1x128xf32> to vector<8x128xf32>
    %66 = arith.addf %64, %65 : vector<8x128xf32>
    %cst_26 = arith.constant 0.000000e+00 : f32
    %67 = vector.broadcast %cst_26 : f32 to vector<8x128xf32>
    %68 = arith.maximumf %66, %67 : vector<8x128xf32>
    %69 = vector.extract_strided_slice %68 {offsets = [0, 0], sizes = [8, 16], strides = [1, 1]} : vector<8x128xf32> to vector<8x16xf32>
    %70 = arith.truncf %69 : vector<8x16xf32> to vector<8x16xbf16>
    %cst_27 = arith.constant dense<0.000000e+00> : vector<8x128xf32>
    %71 = tpu.matmul %70, %3, %cst_27 {dimension_numbers = #tpu.dot_dimension_numbers<[1], [0], [0], [1], [0, 0, 1, 1], [], []>} : vector<8x16xbf16>, vector<16x128xbf16>, vector<8x128xf32> -> vector<8x128xf32>
    %72 = vector.broadcast %11 : vector<1x128xf32> to vector<8x128xf32>
    %73 = arith.addf %71, %72 : vector<8x128xf32>
    %74 = vector.broadcast %18 : vector<8x1xf32> to vector<8x128xf32>
    %75 = arith.mulf %73, %74 : vector<8x128xf32>
    %76 = arith.addf %39, %75 : vector<8x128xf32>
    %77 = vector.extract_strided_slice %76 {offsets = [0, 0], sizes = [8, 32], strides = [1, 1]} : vector<8x128xf32> to vector<8x32xf32>
    %78 = arith.truncf %77 : vector<8x32xf32> to vector<8x32xbf16>
    %cst_28 = arith.constant dense<0.000000e+00> : vector<8x128xf32>
    %79 = tpu.matmul %78, %4, %cst_28 {dimension_numbers = #tpu.dot_dimension_numbers<[1], [0], [0], [1], [0, 0, 1, 1], [], []>} : vector<8x32xbf16>, vector<32x128xbf16>, vector<8x128xf32> -> vector<8x128xf32>
    %80 = vector.broadcast %12 : vector<1x128xf32> to vector<8x128xf32>
    %81 = arith.addf %79, %80 : vector<8x128xf32>
    %cst_29 = arith.constant 0.000000e+00 : f32
    %82 = vector.broadcast %cst_29 : f32 to vector<8x128xf32>
    %83 = arith.maximumf %81, %82 : vector<8x128xf32>
    %84 = vector.extract_strided_slice %83 {offsets = [0, 0], sizes = [8, 16], strides = [1, 1]} : vector<8x128xf32> to vector<8x16xf32>
    %85 = arith.truncf %84 : vector<8x16xf32> to vector<8x16xbf16>
    %cst_30 = arith.constant dense<0.000000e+00> : vector<8x128xf32>
    %86 = tpu.matmul %85, %5, %cst_30 {dimension_numbers = #tpu.dot_dimension_numbers<[1], [0], [0], [1], [0, 0, 1, 1], [], []>} : vector<8x16xbf16>, vector<16x128xbf16>, vector<8x128xf32> -> vector<8x128xf32>
    %87 = vector.broadcast %13 : vector<1x128xf32> to vector<8x128xf32>
    %88 = arith.addf %86, %87 : vector<8x128xf32>
    %c0_31 = arith.constant 0 : index
    %c0_32 = arith.constant 0 : index
    %89 = vector.load %arg6[%c0_31, %c0_32] : memref<8x128xf32, #tpu.memory_space<vmem>>, vector<8x128xf32>
    tpu.vector_store %arg6[%c0_31, %c0_32], %88 {strides = array<i32>} : memref<8x128xf32, #tpu.memory_space<vmem>>, vector<8x128xf32>,
    return
  }
  func.func @transform_0(%arg0: i32) -> (i32, i32, i32) {
    %c0_i32 = arith.constant 0 : i32
    %c0_i32_0 = arith.constant 0 : i32
    %c0_i32_1 = arith.constant 0 : i32
    return %arg0, %c0_i32, %c0_i32_0 : i32, i32, i32
  }
  func.func @transform_1(%arg0: i32) -> (i32, i32, i32) {
    %c0_i32 = arith.constant 0 : i32
    %c0_i32_0 = arith.constant 0 : i32
    %c0_i32_1 = arith.constant 0 : i32
    return %arg0, %c0_i32, %c0_i32_0 : i32, i32, i32
  }
  func.func @transform_2(%arg0: i32) -> (i32, i32) {
    %c0_i32 = arith.constant 0 : i32
    %c0_i32_0 = arith.constant 0 : i32
    return %arg0, %c0_i32 : i32, i32
  }
  func.func @transform_3(%arg0: i32) -> (i32, i32) {
    %c0_i32 = arith.constant 0 : i32
    %c0_i32_0 = arith.constant 0 : i32
    return %arg0, %c0_i32 : i32, i32
  }
  func.func @transform_4(%arg0: i32) -> (i32, i32) {
    %c0_i32 = arith.constant 0 : i32
    %c0_i32_0 = arith.constant 0 : i32
    %c0_i32_1 = arith.constant 0 : i32
    return %c0_i32, %c0_i32_0 : i32, i32
  }
  func.func @transform_5(%arg0: i32) -> (i32, i32) {
    %c0_i32 = arith.constant 0 : i32
    %c0_i32_0 = arith.constant 0 : i32
    return %arg0, %c0_i32 : i32, i32
  }
}

</mosaic_0001>

<bundles_post_ra>
// kernel: tpu_custom_call.1
= control target key start
LH: loop header
LB: loop body
LE: loop exit
PB: predicated region body
PF: predicated region fallthrough
CT: control target
= control target key end

     0   :  { %10 = vsyncpa [#allocation3], 0  ;;  %s2117_s0 = inlined_call_operand.vmem [shape: f32[16,6,16], index: 0, kind: input, shape index: {}]   ;;  %s2118_s1 = inlined_call_operand.vmem [shape: f32[16,24,16], index: 1, kind: input, shape index: {}]   ;;  %s2119_s2 = inlined_call_operand.vmem [shape: s32[16,16], index: 2, kind: input, shape index: {}]   ;;  %s2120_s3 = inlined_call_operand.vmem [shape: s32[16,1], index: 3, kind: input, shape index: {}]   ;;  %s2121_s4 = inlined_call_operand.vmem [shape: bf16[144,128], index: 4, kind: input, shape index: {}]   ;;  %s2122_s5 = inlined_call_operand.hbm [shape: f32[16,128], index: 5, kind: output, shape index: {}]  }
   0x1   :  { %12 = vsyncpa [#allocation3 + $0x1], 0  ;;  %s1709_s18 = smov 0   ;;  %s1711_s19 = smov 0  }
   0x2   :  { %s1713_s20 = smov 0   ;;  %s1715_s21 = smov 0  }
   0x3 LB: > { %s1730_s22 = sadd.s32 4294967295, %s1675_s21   ;;  %s1415_s23 = sadd.s32 4294967294, %s1675_s21   ;;  %s1675_s21 = sphi %s1715_s21, %s2128_s21   ;;  %s1671_s20 = sphi %s1713_s20, %s2127_s20   ;;  %s1667_s19 = sphi %s1711_s19, %s2126_s19   ;;  %s1663_s18 = sphi %s1709_s18, %s2125_s18  }
   0x4   : > { %s1734_s24 = sadd.s32 1, %s1675_s21   ;;  %s150_s25 = sadd.s32 1, %s1671_s20 }
   0x5   : > { %s147_s26 = ssub.s32 %s1675_s21, %s1734_s24  ;;  %p160_p0 = scmp.ne.s32.totalorder %s1671_s20, %s1667_s19 }
   0x6   : > { %p148_p1 = scmp.eq.s32.totalorder %s147_s26, 0  ;;  %p161_p2 = scmp.eq.s32.totalorder %s1730_s22, 1 }
   0x7   : > { %p166_p3 = scmp.ne.s32.totalorder %s1667_s19, %s1663_s18  ;;  %p167_p4 = scmp.eq.s32.totalorder %s1415_s23, 1 }
   0x8   : > { %s1745_s27 = scalar_select %p148_p1, %s1671_s20, %s150_s25  }
   0x9   : > { %p1747_p5 = por %p161_p2, %p160_p0  ;;  %p1751_p6 = por %p167_p4, %p166_p3 }
   0xa   : > { %p1418_p7 = scmp.ge.s32.totalorder %s1675_s21, 1  ;;  %p221_p8 = scmp.lt.s32.totalorder %s1675_s21, 3 }
   0xc   : > { %p222_p9 = pnand %p1418_p7, %p221_p8 }
   0xd   : > { %p276_p10 = scmp.lt.s32.totalorder (!%p222_p9), %s1730_s22, 1  ;;  %s1908_s13 = sshll.u32 (!%p222_p9), %s1730_s22, 3 }
   0xe   : > { %225 = sbr.rel (%p222_p9) target bundleno = 1077 (0x435), region = 40  ;;  %p264_p11 = scmp.lt.s32.totalorder (!%p222_p9), %s1908_s13, 15 }
   0xf   : > { %s260_s8 = sand.u32 (!%p222_p9), 1, %s1667_s19  }
  0x10   : > { %s1305_s17 = scalar_lea.sflag (!%p222_p9), [#allocation3], %s260_s8 }
  0x13   : > { %v494_v0 = vlaneseq  ;;  %v1677_v1 = vmov 0   ;;  %s277_s30 = scalar_select %p276_p10, %s1730_s22, 1  ;;  %v1678_v16 = vmov 0.0   ;;  %vm774_vm5 = vcmask 195584  }
  0x14   : > { %1536 = vset.pattern.permute.xlu0 %v1677_v1  ;;  %s1912_s14 = scalar_select %p264_p11, %s1908_s13, 15 }
  0x15   : > { %v1760_v2 = vshrl.u32 %v494_v0, 7  ;;  %s1424_s6 = sshll.u32 %s277_s30, 3  ;;  %v1787_v14 = vand.u32 127, %v494_v0 }
  0x16   : > { %s283_s9 = scalar_lea.vmem %s2120_s3, %s1424_s6  ;;  %s279_s12 = scalar_lea.vmem %s2119_s2, %s1424_s6 }
  0x17   : > { %1538 = vset.pattern.permute.xlu2 %v1760_v2  ;;  %1537 = vset.pattern.permute.xlu1 %v1760_v2  ;;  %v1770_v3 = vld [vmem:[%s283_s9] sm:$0xff]  ;;  %v1774_v7 = vadd.s32 8, %v1760_v2  ;;  %s1494_s15 = smul.u32 24, %s1912_s14  ;;  %s1421_s22 = sshll.u32 %s1912_s14, 3 }
  0x18   : > { %v493_v4 = vld [vmem:[%s279_s12] sm:$0xff]  ;;  %497 = vperm.xlu0 %1536, %v1770_v3   ;;  %s1961_s30 = scalar_lea.vmem %s2117_s0, %s1421_s22  ;;  %s1419_s9 = sshll.u32 %s260_s8, 3 }
  0x19   : > { %v528_v5 = vperm.slane %v493_v4, 2  ;;  %v502_v6 = vperm.slane %v493_v4, 0  ;;  %v541_v8 = vperm.slane %v493_v4, 3  ;;  %v515_v9 = vperm.slane %v493_v4, 1  ;;  %s1918_s23 = scalar_lea.vmem %s2118_s1, %s1494_s15  ;;  %s1315_s12 = scalar_lea.hbm %s2122_s5, %s1908_s13 }
  0x1a   : > { %v580_v10 = vperm.slane %v493_v4, 6  ;;  %v554_v11 = vperm.slane %v493_v4, 4  ;;  %v567_v12 = vperm.slane %v493_v4, 5  ;;  %v593_v13 = vperm.slane %v493_v4, 7  ;;  %s262_s14 = scalar_lea.vmem [#allocation2], %s1419_s9  ;;  %s1319_s16 = sshll.u32 %s1315_s12, 4  ;;  %s1320_s16 = int_to_ptr.hbm [resolvable:$true] %s1319_s16 }
  0x1b   : > { %s1317_s15 = sshll.u32 %s262_s14, 4  ;;  %s1633_s13 = scalar_lea.hbm %s2122_s5, 16  ;;  %s1318_s15 = int_to_ptr.vmem [resolvable:$true] %s1317_s15 }
  0x1f   : > { %533 = vperm.xlu1 %1537, %v528_v5   ;;  %507 = vperm.xlu2 %1538, %v502_v6  }
  0x20   : > { %1542 = vset.pattern.permute.xlu0 %v1774_v7 }
  0x27   : > { %1539 = vset.pattern.permute.xlu1 %v1774_v7  ;;  %1540 = vset.pattern.permute.xlu2 %v1774_v7 }
  0x28   : > { %552 = vperm.xlu0 %1542, %v541_v8  }
  0x2f   : > { %526 = vperm.xlu1 %1539, %v515_v9   ;;  %539 = vperm.xlu2 %1540, %v528_v5  }
  0x30   : > { %591 = vperm.xlu0 %1542, %v580_v10  }
  0x37   : > { %513 = vperm.xlu1 %1539, %v502_v6   ;;  %1541 = vset.pattern.permute.xlu2 %v1760_v2 }
  0x38   : > { %1547 = vset.pattern.permute.xlu0 %v1760_v2 }
  0x3f   : > { %546 = vperm.xlu2 %1541, %v541_v8   ;;  %1543 = vset.pattern.permute.xlu1 %v1760_v2 }
  0x40   : > { %520 = vperm.xlu0 %1547, %v515_v9  }
  0x47   : > { %1544 = vset.pattern.permute.xlu2 %v1774_v7  ;;  %559 = vperm.xlu1 %1543, %v554_v11  }
  0x48   : > { %572 = vperm.xlu0 %1547, %v567_v12  }
  0x4f   : > { %565 = vperm.xlu2 %1544, %v554_v11   ;;  %1545 = vset.pattern.permute.xlu1 %v1774_v7 }
  0x57   : > { %1546 = vset.pattern.permute.xlu2 %v1760_v2  ;;  %578 = vperm.xlu1 %1545, %v567_v12  }
  0x5f   : > { %585 = vperm.xlu2 %1546, %v580_v10   ;;  %1548 = vset.pattern.permute.xlu1 %v1760_v2 }
  0x67   : > { %1549 = vset.pattern.permute.xlu2 %v1774_v7  ;;  %598 = vperm.xlu1 %1548, %v593_v13  }
  0x6f   : > { %604 = vperm.xlu2 %1549, %v593_v13  }
  0x79   : > { %v508_v30 = vpop.permute.xlu2 %507 }
  0x7a   : > { %vm606_vm6 = vcmp.eq.s32.totalorder %v508_v30, %v1787_v14 }
  0x89   : > { %v540_v32 = vpop.permute.xlu2 %539 }
  0x8a   : > { %v498_v15 = vpop.permute.xlu0 %497  ;;  %vm611_vm1 = vcmp.eq.s32.totalorder %v540_v32, %v1787_v14 }
  0x8b   : > { %vm499_vm0 = vcmp.lt.s32.totalorder %v1787_v14, %v498_v15  ;;  %v1447_v49 = vsel %vm611_vm1, 1.0, %v1678_v16 }
  0x8c   : > { %v1441_v17 = vsel %vm499_vm0, 1.0, %v1678_v16 }
  0x8d   : > { %v732_v18 = vperm.slane %v1441_v17, 6  ;;  %v745_v19 = vperm.slane %v1441_v17, 7  ;;  %v667_v20 = vperm.slane %v1441_v17, 1  ;;  %v680_v21 = vperm.slane %v1441_v17, 2 }
  0x8e   : > { %v654_v24 = vperm.slane %v1441_v17, 0  ;;  %v693_v25 = vperm.slane %v1441_v17, 3  ;;  %v706_v27 = vperm.slane %v1441_v17, 4  ;;  %v719_v28 = vperm.slane %v1441_v17, 5 }
  0x8f   : > { %v1584_v22 = vpack.i.bf16 %v745_v19, %v732_v18  ;;  %v1550_v23 = vpack.i.bf16 %v680_v21, %v667_v20  ;;  %v1442_v18 = vsel %vm606_vm6, 1.0, %v1678_v16 }
  0x90   : > { %v1567_v26 = vpack.i.bf16 %v693_v25, %v654_v24  ;;  %v1573_v29 = vpack.i.bf16 %v719_v28, %v706_v27 }
  0x91   : > { %1585 = vperm.xlu0 %1547, %v1584_v22   ;;  %1551 = vperm.xlu1 %1548, %v1550_v23   ;;  %v534_v31 = vpop.permute.xlu1 %533 }
  0x92   : > { %1556 = vperm.xlu2 %1549, %v1550_v23   ;;  %vm610_vm4 = vcmp.eq.s32.totalorder %v534_v31, %v1787_v14 }
  0x93   : > { %v1446_v56 = vsel %vm610_vm4, 1.0, %v1678_v16 }
  0x99   : > { %1566 = vset.pattern.permute.xlu1 %v1774_v7  ;;  %1596 = vset.pattern.permute.xlu0 %v1774_v7  ;;  %v547_v33 = vpop.permute.xlu2 %546 }
  0x9a   : > { %1560 = vset.pattern.permute.xlu2 %v1760_v2  ;;  %v553_v39 = vpop.permute.xlu0 %552  ;;  %vm612_vm7 = vcmp.eq.s32.totalorder %v547_v33, %v1787_v14 }
  0x9b   : > { %vm613_vm9 = vcmp.eq.s32.totalorder %v553_v39, %v1787_v14  ;;  %v1448_v19 = vsel %vm612_vm7, 1.0, %v1678_v16  ;;  %vm443_vm7 = vcmask 130048  }
  0x9c   : > { %v1449_v28 = vsel %vm613_vm9, 1.0, %v1678_v16  ;;  %vm422_vm9 = vcmask 1041409  }
  0xa1   : > { %1568 = vperm.xlu1 %1566, %v1567_v26   ;;  %v527_v34 = vpop.permute.xlu1 %526 }
  0xa2   : > { %1562 = vperm.xlu2 %1560, %v1567_v26   ;;  %v1808_v42 = vpop.permute.xlu0 %591  ;;  %vm609_vm2 = vcmp.eq.s32.totalorder %v527_v34, %v1787_v14 }
  0xa3   : > { %v1445_v48 = vsel %vm609_vm2, 1.0, %v1678_v16  ;;  %vm619_vm1 = vcmp.eq.s32.totalorder %v1808_v42, %v1787_v14 }
  0xa9   : > { %1572 = vset.pattern.permute.xlu1 %v1760_v2  ;;  %v1798_v35 = vpop.permute.xlu2 %565  ;;  %v514_v36 = vpop.permute.xlu1 %513 }
  0xaa   : > { %1578 = vset.pattern.permute.xlu2 %v1774_v7  ;;  %vm607_vm8 = vcmp.eq.s32.totalorder %v514_v36, %v1787_v14  ;;  %vm615_vm10 = vcmp.eq.s32.totalorder %v1798_v35, %v1787_v14 }
  0xab   : > { %v1443_v27 = vsel %vm607_vm8, 1.0, %v1678_v16  ;;  %vm332_vm8 = vcmask 128000  }
  0xb1   : > { %1574 = vperm.xlu1 %1572, %v1573_v29  }
  0xb2   : > { %1580 = vperm.xlu2 %1578, %v1573_v29   ;;  %v521_v45 = vpop.permute.xlu0 %520 }
  0xb3   : > { %vm608_vm3 = vcmp.eq.s32.totalorder %v521_v45, %v1787_v14 }
  0xb4   : > { %v1444_v50 = vsel %vm608_vm3, 1.0, %v1678_v16 }
  0xb9   : > { %1589 = vset.pattern.permute.xlu1 %v1774_v7  ;;  %v1800_v37 = vpop.permute.xlu1 %559  ;;  %v1802_v38 = vpop.permute.xlu2 %585 }
  0xba   : > { %1595 = vset.pattern.permute.xlu2 %v1760_v2  ;;  %vm614_vm11 = vcmp.eq.s32.totalorder %v1800_v37, %v1787_v14  ;;  %vm618_vm14 = vcmp.eq.s32.totalorder %v1802_v38, %v1787_v14 }
  0xc1   : > { %1591 = vperm.xlu1 %1589, %v1584_v22  }
  0xc9   : > { %v1804_v40 = vpop.permute.xlu1 %578  ;;  %v1806_v41 = vpop.permute.xlu2 %604 }
  0xca   : > { %vm617_vm13 = vcmp.eq.s32.totalorder %v1804_v40, %v1787_v14  ;;  %vm621_vm0 = vcmp.eq.s32.totalorder %v1806_v41, %v1787_v14 }
  0xd9   : > { %v1810_v43 = vpop.permute.xlu1 %598 }
  0xda   : > { %vm620_vm15 = vcmp.eq.s32.totalorder %v1810_v43, %v1787_v14 }
  0xdb   : > { %v1456_v38 = vsel %vm620_vm15, 1.0, %v1678_v16  ;;  %vm434_vm15 = vcmask 1047559  }
  0xec   : > { %v1557_v44 = vpop.permute.xlu2 %1556 }
  0xed   : > { %v1559_v46 = vunpack.i.h.bf16 %v1557_v44  ;;  %v1558_v47 = vunpack.i.l.bf16 %v1557_v44 }
  0xef   : > { %v763_v52 = vmul.f32 %v1559_v46, %v1447_v49  ;;  %v761_v53 = vmul.f32 %v1558_v47, %v1445_v48 }
  0xf1   : > { %v794_v59 = vsel %vm774_vm5, %v763_v52, 0.0  ;;  %v785_v60 = vsel %vm774_vm5, %v761_v53, 0.0 }
  0xfc   : > { %v1563_v6 = vpop.permute.xlu2 %1562 }
  0xfd   : > { %v1565_v12 = vunpack.i.h.bf16 %v1563_v6  ;;  %v1564_v13 = vunpack.i.l.bf16 %v1563_v6 }
  0xff   : > { %v764_v23 = vmul.f32 %v1565_v12, %v1448_v19  ;;  %v758_v24 = vmul.f32 %v1564_v13, %v1442_v18 }
 0x101   : > { %v802_v33 = vsel %vm774_vm5, %v764_v23, 0.0  ;;  %v775_v34 = vsel %vm774_vm5, %v758_v24, 0.0 }
 0x103   : > { %v1552_v51 = vpop.permute.xlu1 %1551 }
 0x104   : > { %v1554_v54 = vunpack.i.h.bf16 %v1552_v51  ;;  %v1553_v55 = vunpack.i.l.bf16 %v1552_v51 }
 0x106   : > { %v762_v57 = vmul.f32 %v1554_v54, %v1446_v56  ;;  %v760_v58 = vmul.f32 %v1553_v55, %v1444_v50  ;;  %v573_v54 = vpop.permute.xlu0 %572 }
 0x107   : > { %vm616_vm12 = vcmp.eq.s32.totalorder %v573_v54, %v1787_v14 }
 0x108   : > { %v793_v61 = vsel %vm774_vm5, %v762_v57, 0.0  ;;  %v784_v62 = vsel %vm774_vm5, %v760_v58, 0.0  ;;  %v1451_v57 = vsel %vm615_vm10, 1.0, %v1678_v16  ;;  %vm424_vm10 = vcmask 1042434  }
 0x109   : > { %v786_v63 = vadd.f32 %v785_v60, %v784_v62  ;;  %v795_v0 = vadd.f32 %v794_v59, %v793_v61 }
 0x10b   : > { %v787_v4 = vrot.slane %v786_v63, 4  ;;  %v796_v5 = vrot.slane %v795_v0, 4 }
 0x10c   : > { %v1581_v48 = vpop.permute.xlu2 %1580 }
 0x10d   : > { %v797_v8 = vadd.f32 %v796_v5, %v795_v0  ;;  %v788_v9 = vadd.f32 %v787_v4, %v786_v63  ;;  %v1582_v53 = vunpack.i.l.bf16 %v1581_v48  ;;  %v1583_v35 = vunpack.i.h.bf16 %v1581_v48 }
 0x10e   : > { %v1450_v0 = vsel %vm614_vm11, 1.0, %v1678_v16  ;;  %v1452_v4 = vsel %vm616_vm12, 1.0, %v1678_v16  ;;  %v1586_v19 = vpop.permute.xlu0 %1585  ;;  %vm426_vm11 = vcmask 1043459   ;;  %vm428_vm12 = vcmask 1044484  }
 0x10f   : > { %v798_v10 = vrot.slane %v797_v8, 2  ;;  %v789_v11 = vrot.slane %v788_v9, 2  ;;  %v767_v61 = vmul.f32 %v1582_v53, %v1451_v57  ;;  %v1588_v23 = vunpack.i.h.bf16 %v1586_v19 }
 0x110   : > { %v1587_v24 = vunpack.i.l.bf16 %v1586_v19 }
 0x111   : > { %v799_v15 = vadd.f32 %v798_v10, %v797_v8  ;;  %v790_v17 = vadd.f32 %v789_v11, %v788_v9  ;;  %v1453_v9 = vsel %vm617_vm13, 1.0, %v1678_v16  ;;  %v812_v10 = vsel %vm774_vm5, %v767_v61, 0.0 }
 0x112   : > { %v769_v40 = vmul.f32 %v1583_v35, %v1453_v9  ;;  %vm430_vm13 = vcmask 1045509  }
 0x113   : > { %v1569_v20 = vpop.permute.xlu1 %1568  ;;  %v800_v21 = vrot.slane %v799_v15, 1  ;;  %v791_v22 = vrot.slane %v790_v17, 1 }
 0x114   : > { %v1571_v25 = vunpack.i.h.bf16 %v1569_v20  ;;  %v1570_v26 = vunpack.i.l.bf16 %v1569_v20  ;;  %v821_v18 = vsel %vm774_vm5, %v769_v40, 0.0 }
 0x115   : > { %v1832_v29 = vadd.f32 %v800_v21, %v799_v15  ;;  %v1834_v30 = vadd.f32 %v791_v22, %v790_v17  ;;  %v1867_v17 = vadd.s32 16, %v1760_v2 }
 0x116   : > { %v765_v31 = vmul.f32 %v1571_v25, %v1449_v28  ;;  %v759_v32 = vmul.f32 %v1570_v26, %v1443_v27  ;;  %v307_v27 = vcvt.s32.f32 %v1770_v3  ;;  %v1454_v28 = vsel %vm618_vm14, 1.0, %v1678_v16 }
 0x117   : > { %893 = vperm.xlu0 %1596, %v1832_v29   ;;  %875 = vperm.xlu1 %1589, %v1834_v30   ;;  %vm432_vm14 = vcmask 1046534  }
 0x118   : > { %v803_v36 = vsel %vm774_vm5, %v765_v31, 0.0  ;;  %v776_v39 = vsel %vm774_vm5, %v759_v32, 0.0  ;;  %869 = vperm.xlu2 %1595, %v1834_v30   ;;  %v770_v32 = vmul.f32 %v1587_v24, %v1454_v28  ;;  %v997_v28 = vld [vmem:[%s1918_s23 + $0x30] sm:$0xff] }
 0x119   : > { %v777_v44 = vadd.f32 %v776_v39, %v775_v34  ;;  %v804_v45 = vadd.f32 %v803_v36, %v802_v33  ;;  %v772_v33 = vmul.f32 %v1588_v23, %v1456_v38  ;;  %v1457_v39 = vsel %vm621_vm0, 1.0, %v1678_v16  ;;  %v1001_v38 = vld [vmem:[%s1918_s23 + $0x50] sm:$0xff] }
 0x11a   : > { %v829_v42 = vsel %vm774_vm5, %v770_v32, 0.0  ;;  %v991_v32 = vld [vmem:[%s1918_s23] sm:$0xff]  ;;  %vm475_vm0 = vcmask 261120  }
 0x11b   : > { %v778_v46 = vrot.slane %v777_v44, 4  ;;  %v805_v47 = vrot.slane %v804_v45, 4 }
 0x11d   : > { %v806_v49 = vadd.f32 %v805_v47, %v804_v45  ;;  %v779_v50 = vadd.f32 %v778_v46, %v777_v44  ;;  %v1455_v44 = vsel %vm619_vm1, 1.0, %v1678_v16  ;;  %v838_v47 = vsel %vm774_vm5, %v772_v33, 0.0 }
 0x11f   : > { %1597 = vset.pattern.permute.xlu1 %v1760_v2  ;;  %v807_v51 = vrot.slane %v806_v49, 2  ;;  %v780_v52 = vrot.slane %v779_v50, 2 }
 0x120   : > { %887 = vperm.xlu2 %1595, %v1832_v29  }
 0x121   : > { %v808_v55 = vadd.f32 %v807_v51, %v806_v49  ;;  %v781_v56 = vadd.f32 %v780_v52, %v779_v50  ;;  %v308_v50 = vmax.f32 %v307_v27, 1.0  ;;  %v995_v27 = vld [vmem:[%s1918_s23 + $0x20] sm:$0xff] }
 0x123   : > { %v1575_v58 = vpop.permute.xlu1 %1574  ;;  %v809_v59 = vrot.slane %v808_v55, 1  ;;  %v782_v60 = vrot.slane %v781_v56, 1  ;;  %1611 = vrcp.f32 %v308_v50  ;;  %vm314_vm2 = vweird.f32 %v308_v50 }
 0x124   : > { %v1577_v62 = vunpack.i.h.bf16 %v1575_v58  ;;  %v1576_v63 = vunpack.i.l.bf16 %v1575_v58  ;;  %v318_v61 = vand.u32 2147483647, %v308_v50 }
 0x125   : > { %v1855_v5 = vadd.f32 %v809_v59, %v808_v55  ;;  %v1857_v37 = vadd.f32 %v782_v60, %v781_v56  ;;  %v320_v60 = vand.u32 2147483648, %v308_v50 }
 0x126   : > { %v768_v6 = vmul.f32 %v1577_v62, %v1452_v4  ;;  %v766_v8 = vmul.f32 %v1576_v63, %v1450_v0  ;;  %vm319_vm6 = vcmp.eq.f32.partialorder %v318_v61, 8.507059e+37 }
 0x127   : > { %911 = vperm.xlu0 %1596, %v1855_v5   ;;  %851 = vperm.xlu1 %1597, %v1857_v37   ;;  %v321_v62 = vor.u32 1.1754944e-38, %v320_v60 }
 0x128   : > { %v811_v11 = vsel %vm774_vm5, %v766_v8, 0.0  ;;  %1598 = vset.pattern.permute.xlu2 %v1774_v7  ;;  %v820_v13 = vsel %vm774_vm5, %v768_v6, 0.0 }
 0x129   : > { %v813_v12 = vadd.f32 %v812_v10, %v811_v11  ;;  %v822_v20 = vadd.f32 %v821_v18, %v820_v13  ;;  %v1612_v55 = vpop.eup %1611 }
 0x12a   : > { %v310_v57 = vmul.f32 %v1612_v55, %v308_v50  ;;  %vm315_vm3 = vweird.f32 %v1612_v55  ;;  %v993_v50 = vld [vmem:[%s1918_s23 + $0x10] sm:$0xff] }
 0x12b   : > { %v814_v15 = vrot.slane %v813_v12, 4  ;;  %v823_v25 = vrot.slane %v822_v20, 4  ;;  %vm316_vm4 = vmor %vm314_vm2, %vm315_vm3 }
 0x12c   : > { %v311_v58 = vsub.f32 1.0, %v310_v57 }
 0x12d   : > { %v815_v21 = vadd.f32 %v814_v15, %v813_v12  ;;  %v824_v45 = vadd.f32 %v823_v25, %v822_v20  ;;  %v998_v25 = vld [vmem:[%s1918_s23 + $0x38] sm:$0xff] }
 0x12e   : > { %v312_v59 = vmul.f32 %v1612_v55, %v311_v58 }
 0x12f   : > { %1599 = vset.pattern.permute.xlu1 %v1867_v17  ;;  %v816_v22 = vrot.slane %v815_v21, 2  ;;  %v825_v53 = vrot.slane %v824_v45, 2 }
 0x130   : > { %857 = vperm.xlu2 %1598, %v1857_v37   ;;  %v313_v35 = vadd.f32 %v1612_v55, %v312_v59 }
 0x131   : > { %v817_v26 = vadd.f32 %v816_v22, %v815_v21  ;;  %v826_v54 = vadd.f32 %v825_v53, %v824_v45  ;;  %v1002_v45 = vld [vmem:[%s1918_s23 + $0x58] sm:$0xff] }
 0x132   : > { %v317_v0 = vsel %vm316_vm4, %v1612_v55, %v313_v35 }
 0x133   : > { %v1592_v31 = vpop.permute.xlu1 %1591  ;;  %v818_v43 = vrot.slane %v817_v26, 1  ;;  %v322_v6 = vsel %vm319_vm6, %v321_v62, %v317_v0 }
 0x134   : > { %v1594_v34 = vunpack.i.h.bf16 %v1592_v31  ;;  %v1593_v36 = vunpack.i.l.bf16 %v1592_v31  ;;  %v1000_v31 = vld [vmem:[%s1918_s23 + $0x48] sm:$0xff] }
 0x135   : > { %v819_v41 = vadd.f32 %v818_v43, %v817_v26  ;;  %v994_v26 = vld [vmem:[%s1918_s23 + $0x18] sm:$0xff] }
 0x136   : > { %v771_v46 = vmul.f32 %v1593_v36, %v1455_v44  ;;  %v773_v14 = vmul.f32 %v1594_v34, %v1457_v39  ;;  %v1004_v34 = vld [vmem:[%s1918_s23 + $0x68] sm:$0xff] }
 0x137   : > { %929 = vperm.xlu0 %1596, %v819_v41   ;;  %881 = vperm.xlu1 %1599, %v1834_v30   ;;  %v827_v30 = vrot.slane %v826_v54, 1  ;;  %v996_v36 = vld [vmem:[%s1918_s23 + $0x28] sm:$0xff] }
 0x138   : > { %v830_v48 = vsel %vm774_vm5, %v771_v46, 0.0  ;;  %v839_v49 = vsel %vm774_vm5, %v773_v14, 0.0  ;;  %1600 = vset.pattern.permute.xlu2 %v1760_v2  ;;  %vm304_vm5 = vcmp.gt.s32.totalorder %v1770_v3, 0  ;;  %v992_v44 = vld [vmem:[%s1918_s23 + $0x8] sm:$0xff] }
 0x139   : > { %v831_v51 = vadd.f32 %v830_v48, %v829_v42  ;;  %v840_v52 = vadd.f32 %v839_v49, %v838_v47  ;;  %v828_v56 = vadd.f32 %v827_v30, %v826_v54  ;;  %v1003_v48 = vld [vmem:[%s1918_s23 + $0x60] sm:$0xff] }
 0x13b   : > { %v841_v4 = vrot.slane %v840_v52, 4 }
 0x13d   : > { %v842_v10 = vadd.f32 %v841_v4, %v840_v52 }
 0x13f   : > { %1602 = vset.pattern.permute.xlu0 %v1760_v2  ;;  %899 = vperm.xlu1 %1599, %v1832_v29   ;;  %v832_v29 = vrot.slane %v831_v51, 4  ;;  %v843_v11 = vrot.slane %v842_v10, 2 }
 0x140   : > { %905 = vperm.xlu2 %1600, %v1855_v5  }
 0x141   : > { %v833_v63 = vadd.f32 %v832_v29, %v831_v51  ;;  %v844_v13 = vadd.f32 %v843_v11, %v842_v10  ;;  %v1005_v51 = vld [vmem:[%s1918_s23 + $0x70] sm:$0xff] }
 0x143   : > { %v834_v8 = vrot.slane %v833_v63, 2 }
 0x145   : > { %v835_v40 = vadd.f32 %v834_v8, %v833_v63 }
 0x147   : > { %941 = vperm.xlu0 %1602, %v828_v56   ;;  %863 = vperm.xlu1 %1599, %v1857_v37   ;;  %v1426_v37 = vsel %vm304_vm5, 1.0, %v1678_v16  ;;  %v836_v3 = vrot.slane %v835_v40, 1 }
 0x148   : > { %923 = vperm.xlu2 %1600, %v819_v41   ;;  %v323_v9 = vmul.f32 %v1426_v37, %v322_v6 }
 0x149   : > { %v837_v12 = vadd.f32 %v836_v3, %v835_v40 }
 0x14f   : > { %1606 = vset.pattern.permute.xlu0 %v1867_v17  ;;  %1603 = vset.pattern.permute.xlu1 %v1774_v7 }
 0x150   : > { %1601 = vset.pattern.permute.xlu2 %v1867_v17 }
 0x157   : > { %953 = vperm.xlu0 %1606, %v828_v56   ;;  %947 = vperm.xlu1 %1603, %v828_v56  }
 0x158   : > { %917 = vperm.xlu2 %1601, %v1855_v5   ;;  %v845_v5 = vrot.slane %v844_v13, 1 }
 0x15a   : > { %v846_v16 = vadd.f32 %v845_v5, %v844_v13 }
 0x15f   : > { %1609 = vset.pattern.permute.xlu0 %v1677_v1  ;;  %1604 = vset.pattern.permute.xlu1 %v1760_v2 }
 0x160   : > { %935 = vperm.xlu2 %1601, %v819_v41   ;;  %1129 = vperm.xlu0 %1609, %v323_v9   ;;  %v999_v41 = vld [vmem:[%s1918_s23 + $0x40] sm:$0xff] }
 0x167   : > { %959 = vperm.xlu1 %1604, %v837_v12  }
 0x168   : > { %1605 = vset.pattern.permute.xlu2 %v1774_v7 }
 0x16f   : > { %977 = vperm.xlu1 %1604, %v846_v16  }
 0x170   : > { %965 = vperm.xlu2 %1605, %v837_v12  }
 0x172   : > { %v870_v2 = vpop.permute.xlu2 %869 }
 0x173   : > { %v1018_v46 = vmul.f32 %v994_v26, %v870_v2  ;;  %v1008_v26 = vld [vmem:[%s1918_s23 + $0x88] sm:$0xff] }
 0x175   : > { %v1050_v61 = vsel %vm443_vm7, %v1018_v46, 0.0 }
 0x177   : > { %1607 = vset.pattern.permute.xlu1 %v1867_v17 }
 0x178   : > { %983 = vperm.xlu2 %1605, %v846_v16  }
 0x17a   : > { %v888_v15 = vpop.permute.xlu2 %887 }
 0x17b   : > { %v1021_v14 = vmul.f32 %v997_v28, %v888_v15 }
 0x17d   : > { %v1061_v62 = vsel %vm443_vm7, %v1021_v14, 0.0 }
 0x17f   : > { %971 = vperm.xlu1 %1607, %v837_v12  }
 0x180   : > { %1608 = vset.pattern.permute.xlu2 %v1867_v17 }
 0x187   : > { %1610 = vset.pattern.permute.xlu1 %v1677_v1 }
 0x188   : > { %989 = vperm.xlu2 %1608, %v846_v16   ;;  %1243 = vperm.xlu1 %1610, %v1426_v37  }
 0x189   : > { %v876_v19 = vpop.permute.xlu1 %875  ;;  %v894_v21 = vpop.permute.xlu0 %893 }
 0x18a   : > { %v858_v18 = vpop.permute.xlu2 %857  ;;  %v1022_v43 = vmul.f32 %v998_v25, %v894_v21  ;;  %v1019_v39 = vmul.f32 %v995_v27, %v876_v19  ;;  %v1007_v27 = vld [vmem:[%s1918_s23 + $0x80] sm:$0xff] }
 0x18b   : > { %v1016_v56 = vmul.f32 %v992_v44, %v858_v18 }
 0x18c   : > { %v1062_v55 = vsel %vm443_vm7, %v1022_v43, 0.0  ;;  %v1051_v59 = vsel %vm443_vm7, %v1019_v39, 0.0 }
 0x18d   : > { %v1063_v4 = vadd.f32 %v1062_v55, %v1061_v62  ;;  %v1052_v9 = vadd.f32 %v1051_v59, %v1050_v61  ;;  %v1040_v40 = vsel %vm443_vm7, %v1016_v56, 0.0  ;;  %v1010_v59 = vld [vmem:[%s1918_s23 + $0x98] sm:$0xff] }
 0x199   : > { %v852_v20 = vpop.permute.xlu1 %851  ;;  %v912_v1 = vpop.permute.xlu0 %911 }
 0x19a   : > { %v906_v7 = vpop.permute.xlu2 %905  ;;  %v1025_v42 = vmul.f32 %v1001_v38, %v912_v1  ;;  %v1015_v52 = vmul.f32 %v991_v32, %v852_v20 }
 0x19b   : > { %v1024_v47 = vmul.f32 %v1000_v31, %v906_v7 }
 0x19c   : > { %v1073_v63 = vsel %vm443_vm7, %v1025_v42, 0.0  ;;  %v1039_v37 = vsel %vm443_vm7, %v1015_v52, 0.0 }
 0x19d   : > { %v1072_v0 = vsel %vm443_vm7, %v1024_v47, 0.0  ;;  %v1041_v16 = vadd.f32 %v1040_v40, %v1039_v37  ;;  %v1013_v37 = vld [vmem:[%s1918_s23 + $0xb0] sm:$0xff] }
 0x19e   : > { %v1074_v11 = vadd.f32 %v1073_v63, %v1072_v0 }
 0x1a2   : > { %v924_v17 = vpop.permute.xlu2 %923 }
 0x1a3   : > { %v1027_v29 = vmul.f32 %v1003_v48, %v924_v17  ;;  %v1006_v17 = vld [vmem:[%s1918_s23 + $0x78] sm:$0xff] }
 0x1a5   : > { %v1083_v12 = vsel %vm443_vm7, %v1027_v29, 0.0 }
 0x1a9   : > { %v882_v22 = vpop.permute.xlu1 %881  ;;  %v930_v33 = vpop.permute.xlu0 %929 }
 0x1aa   : > { %v1028_v53 = vmul.f32 %v1004_v34, %v930_v33  ;;  %v1020_v54 = vmul.f32 %v996_v36, %v882_v22 }
 0x1ac   : > { %v1084_v6 = vsel %vm443_vm7, %v1028_v53, 0.0  ;;  %v1053_v8 = vsel %vm443_vm7, %v1020_v54, 0.0 }
 0x1ad   : > { %v1085_v2 = vadd.f32 %v1084_v6, %v1083_v12  ;;  %v1054_v15 = vadd.f32 %v1053_v8, %v1052_v9  ;;  %v324_v6 = vld [vmem:[%s1961_s30] sm:$0x3f]  ;;  %v325_v8 = vld [vmem:[%s1961_s30 + $0x8] sm:$0x3f] }
 0x1ae   : > { %v333_v12 = vsel %vm332_vm8, %v324_v6, 0.0  ;;  %v331_v6 = vld [vmem:[%s1961_s30 + $0x38] sm:$0x3f] }
 0x1af   : > { %v1055_v22 = vrot.slane %v1054_v15, 4 }
 0x1b1   : > { %v900_v23 = vpop.permute.xlu1 %899  ;;  %v1056_v38 = vadd.f32 %v1055_v22, %v1054_v15 }
 0x1b2   : > { %v918_v24 = vpop.permute.xlu2 %917  ;;  %v1023_v57 = vmul.f32 %v999_v41, %v900_v23 }
 0x1b3   : > { %v1026_v58 = vmul.f32 %v1002_v45, %v918_v24  ;;  %v1057_v46 = vrot.slane %v1056_v38, 2 }
 0x1b4   : > { %v1064_v10 = vsel %vm443_vm7, %v1023_v57, 0.0 }
 0x1b5   : > { %v1075_v3 = vsel %vm443_vm7, %v1026_v58, 0.0  ;;  %v1065_v19 = vadd.f32 %v1064_v10, %v1063_v4  ;;  %v1058_v53 = vadd.f32 %v1057_v46, %v1056_v38 }
 0x1b6   : > { %v1076_v7 = vadd.f32 %v1075_v3, %v1074_v11 }
 0x1b7   : > { %v1066_v1 = vrot.slane %v1065_v19, 4  ;;  %v1059_v58 = vrot.slane %v1058_v53, 1 }
 0x1b8   : > { %v1077_v23 = vrot.slane %v1076_v7, 4 }
 0x1b9   : > { %v864_v49 = vpop.permute.xlu1 %863  ;;  %v942_v18 = vpop.permute.xlu0 %941  ;;  %v1067_v32 = vadd.f32 %v1066_v1, %v1065_v19  ;;  %v1060_v9 = vadd.f32 %v1059_v58, %v1058_v53 }
 0x1ba   : > { %v936_v30 = vpop.permute.xlu2 %935  ;;  %v1017_v60 = vmul.f32 %v993_v50, %v864_v49  ;;  %v1030_v28 = vmul.f32 %v1006_v17, %v942_v18  ;;  %v1078_v33 = vadd.f32 %v1077_v23, %v1076_v7  ;;  %v326_v18 = vld [vmem:[%s1961_s30 + $0x10] sm:$0x3f] }
 0x1bb   : > { %v1029_v35 = vmul.f32 %v1005_v51, %v936_v30  ;;  %v1068_v42 = vrot.slane %v1067_v32, 2 }
 0x1bc   : > { %v1042_v13 = vsel %vm443_vm7, %v1017_v60, 0.0  ;;  %v1094_v41 = vsel %vm443_vm7, %v1030_v28, 0.0  ;;  %v1079_v47 = vrot.slane %v1078_v33, 2  ;;  %v347_v28 = vsel %vm332_vm8, %v326_v18, 0.0 }
 0x1bd   : > { %v1086_v5 = vsel %vm443_vm7, %v1029_v35, 0.0  ;;  %v1043_v20 = vadd.f32 %v1042_v13, %v1041_v16  ;;  %v1069_v54 = vadd.f32 %v1068_v42, %v1067_v32  ;;  %v340_v13 = vsel %vm332_vm8, %v325_v8, 0.0  ;;  %v328_v32 = vld [vmem:[%s1961_s30 + $0x20] sm:$0x3f] }
 0x1be   : > { %v1087_v21 = vadd.f32 %v1086_v5, %v1085_v2  ;;  %v1080_v30 = vadd.f32 %v1079_v47, %v1078_v33  ;;  %v341_v22 = vrot.slane %v340_v13, 4  ;;  %v348_v33 = vrot.slane %v347_v28, 4 }
 0x1bf   : > { %v1044_v24 = vrot.slane %v1043_v20, 4  ;;  %v1070_v29 = vrot.slane %v1069_v54, 1  ;;  %v361_v58 = vsel %vm332_vm8, %v328_v32, 0.0 }
 0x1c0   : > { %v1088_v25 = vrot.slane %v1087_v21, 4  ;;  %v1081_v60 = vrot.slane %v1080_v30, 1 }
 0x1c1   : > { %v1045_v39 = vadd.f32 %v1044_v24, %v1043_v20  ;;  %v1071_v3 = vadd.f32 %v1070_v29, %v1069_v54  ;;  %v327_v20 = vld [vmem:[%s1961_s30 + $0x18] sm:$0x3f] }
 0x1c2   : > { %v1089_v44 = vadd.f32 %v1088_v25, %v1087_v21  ;;  %v1082_v11 = vadd.f32 %v1081_v60, %v1080_v30  ;;  %v334_v21 = vrot.slane %v333_v12, 4  ;;  %v330_v60 = vld [vmem:[%s1961_s30 + $0x30] sm:$0x3f] }
 0x1c3   : > { %v1046_v50 = vrot.slane %v1045_v39, 2 }
 0x1c4   : > { %v1090_v51 = vrot.slane %v1089_v44, 2 }
 0x1c5   : > { %v1047_v55 = vadd.f32 %v1046_v50, %v1045_v39  ;;  %v1014_v39 = vld [vmem:[%s1918_s23 + $0xb8] sm:$0xff]  ;;  %v1009_v50 = vld [vmem:[%s1918_s23 + $0x90] sm:$0xff] }
 0x1c6   : > { %v1091_v56 = vadd.f32 %v1090_v51, %v1089_v44  ;;  %v329_v44 = vld [vmem:[%s1961_s30 + $0x28] sm:$0x3f] }
 0x1c7   : > { %v1048_v61 = vrot.slane %v1047_v55, 1 }
 0x1c8   : > { %v1092_v62 = vrot.slane %v1091_v56, 1 }
 0x1c9   : > { %v954_v31 = vpop.permute.xlu0 %953  ;;  %v948_v43 = vpop.permute.xlu1 %947  ;;  %v1049_v5 = vadd.f32 %v1048_v61, %v1047_v55 }
 0x1ca   : > { %v1032_v34 = vmul.f32 %v1008_v26, %v954_v31  ;;  %v1031_v36 = vmul.f32 %v1007_v27, %v948_v43  ;;  %v966_v49 = vpop.permute.xlu2 %965  ;;  %v1971_v16 = vadd.f32 %v1092_v62, %v1091_v56  ;;  %v335_v26 = vadd.f32 %v334_v21, %v333_v12  ;;  %v1012_v43 = vld [vmem:[%s1918_s23 + $0xa8] sm:$0xff] }
 0x1cb   : > { %v1034_v0 = vmul.f32 %v1010_v59, %v966_v49  ;;  %v342_v27 = vadd.f32 %v341_v22, %v340_v13  ;;  %v349_v49 = vadd.f32 %v348_v33, %v347_v28  ;;  %v368_v59 = vsel %vm332_vm8, %v329_v44, 0.0 }
 0x1cc   : > { %v1095_v45 = vsel %vm443_vm7, %v1031_v36, 0.0  ;;  %v1097_v48 = vsel %vm443_vm7, %v1032_v34, 0.0  ;;  %v354_v34 = vsel %vm332_vm8, %v327_v20, 0.0 }
 0x1cd   : > { %v1096_v14 = vadd.f32 %v1095_v45, %v1094_v41  ;;  %v1975_v19 = vsel %vm443_vm7, %v1034_v0, 0.0  ;;  %v336_v41 = vrot.slane %v335_v26, 2  ;;  %v343_v45 = vrot.slane %v342_v27, 2 }
 0x1ce   : > { %v355_v46 = vrot.slane %v354_v34, 4 }
 0x1cf   : > { %v1098_v52 = vadd.f32 %v1097_v48, %v1096_v14  ;;  %v337_v53 = vadd.f32 %v336_v41, %v335_v26  ;;  %v344_v54 = vadd.f32 %v343_v45, %v342_v27 }
 0x1d0   : > { %v356_v30 = vadd.f32 %v355_v46, %v354_v34 }
 0x1d1   : > { %v1099_v57 = vrot.slane %v1098_v52, 4  ;;  %v338_v61 = vrot.slane %v337_v53, 1  ;;  %v345_v62 = vrot.slane %v344_v54, 1 }
 0x1d2   : > { %v1963_v35 = vpop.permute.xlu0 %1129  ;;  %v984_v4 = vpop.permute.xlu2 %983  ;;  %v357_v8 = vrot.slane %v356_v30, 2 }
 0x1d3   : > { %v1100_v63 = vadd.f32 %v1099_v57, %v1098_v52  ;;  %v1131_v40 = vrot.slane %v1963_v35, 1  ;;  %v1037_v15 = vmul.f32 %v1013_v37, %v984_v4  ;;  %v1132_v7 = vrot.slane %v1963_v35, 2  ;;  %v1489_v57 = vld [vmem:[%s2121_s4 + $0x18] sm:$0xff] }
 0x1d4   : > { %v1133_v17 = vrot.slane %v1963_v35, 3  ;;  %v1134_v1 = vrot.slane %v1963_v35, 4  ;;  %v1982_v23 = vmul.f32 %v1963_v35, %v1049_v5  ;;  %v1135_v25 = vrot.slane %v1963_v35, 5  ;;  %1210 = vmatpush.bf16.msra.mxu2 %v1489_v57  ;;  %v1486_v57 = vld [vmem:[%s2121_s4] sm:$0xff] }
 0x1d5   : > { %v1101_v2 = vrot.slane %v1100_v63, 2  ;;  %v1984_v24 = vmul.f32 %v1131_v40, %v1060_v9  ;;  %v1117_v31 = vsel %vm443_vm7, %v1037_v15, 0.0  ;;  %v1994_v36 = vmul.f32 %v1132_v7, %v1071_v3  ;;  %454 = vmatpush.bf16.msra.mxu0 %v1486_v57 }
 0x1d6   : > { %v1998_v14 = vmul.f32 %v1133_v17, %v1082_v11  ;;  %v1154_v42 = vpack.c.bf16 %v1982_v23, %v1982_v23  ;;  %v339_v9 = vadd.f32 %v338_v61, %v337_v53  ;;  %v346_v40 = vadd.f32 %v345_v62, %v344_v54 }
 0x1d7   : > { %v1988_v38 = vadd.f32 %v1101_v2, %v1100_v63  ;;  %v1155_v47 = vpack.c.bf16 %v1984_v24, %v1984_v24  ;;  %v350_v63 = vrot.slane %v349_v49, 2  ;;  %v362_v11 = vrot.slane %v361_v58, 4 }
 0x1d8   : > { %v358_v13 = vadd.f32 %v357_v8, %v356_v30  ;;  %v369_v5 = vrot.slane %v368_v59, 4  ;;  %v375_v2 = vsel %vm332_vm8, %v330_v60, 0.0  ;;  %v390_v41 = vmul.f32 0.16666667, %v346_v40 }
 0x1d9   : > { %v960_v10 = vpop.permute.xlu1 %959  ;;  %v1103_v55 = vrot.slane %v1988_v38, 1  ;;  %v351_v3 = vadd.f32 %v350_v63, %v349_v49  ;;  %v363_v18 = vadd.f32 %v362_v11, %v361_v58  ;;  %v376_v7 = vrot.slane %v375_v2, 4 }
 0x1da   : > { %v1033_v0 = vmul.f32 %v1009_v50, %v960_v10  ;;  %v382_v10 = vsel %vm332_vm8, %v331_v6, 0.0  ;;  %v359_v21 = vrot.slane %v358_v13, 1  ;;  %v370_v22 = vadd.f32 %v369_v5, %v368_v59 }
 0x1db   : > { %v352_v15 = vrot.slane %v351_v3, 1  ;;  %v383_v17 = vrot.slane %v382_v10, 4  ;;  %v364_v27 = vrot.slane %v363_v18, 2  ;;  %v377_v28 = vadd.f32 %v376_v7, %v375_v2 }
 0x1dc   : > { %v360_v32 = vadd.f32 %v359_v21, %v358_v13  ;;  %v371_v33 = vrot.slane %v370_v22, 2  ;;  %v398_v54 = vpack.c.bf16 %v390_v41, %v390_v41  ;;  %v1105_v30 = vsel %vm443_vm7, %v1033_v0, 0.0 }
 0x1dd   : > { %v353_v26 = vadd.f32 %v352_v15, %v351_v3  ;;  %v384_v34 = vadd.f32 %v383_v17, %v382_v10  ;;  %v378_v44 = vrot.slane %v377_v28, 2  ;;  %v1150_v41 = vmul.f32 %v1134_v1, %v1971_v16 }
 0x1de   : > { %v392_v50 = vmul.f32 0.16666667, %v360_v32  ;;  %v415_v8 = vunpack.c.l.b16 %v398_v54  ;;  %v1171_v54 = vunpack.c.l.b16 %v1154_v42 }
 0x1df   : > { %v391_v45 = vmul.f32 0.16666667, %v353_v26  ;;  %v385_v49 = vrot.slane %v384_v34, 2 }
 0x1e0   : > { %v400_v62 = vpack.c.bf16 %v392_v50, %v392_v50 }
 0x1e1   : > { %v978_v48 = vpop.permute.xlu1 %977  ;;  %v386_v59 = vadd.f32 %v385_v49, %v384_v34  ;;  %v1172_v34 = vunpack.c.l.b16 %v1155_v47 }
 0x1e2   : > { %v1036_v51 = vmul.f32 %v1012_v43, %v978_v48  ;;  %v990_v52 = vpop.permute.xlu2 %989  ;;  %v372_v48 = vadd.f32 %v371_v33, %v370_v22  ;;  %v417_v2 = vunpack.c.l.b16 %v400_v62 }
 0x1e3   : > { %v1038_v56 = vmul.f32 %v1014_v39, %v990_v52  ;;  %v365_v39 = vadd.f32 %v364_v27, %v363_v18  ;;  %v379_v52 = vadd.f32 %v378_v44, %v377_v28  ;;  %v387_v0 = vrot.slane %v386_v59, 1 }
 0x1e4   : > { %v1116_v29 = vsel %vm443_vm7, %v1036_v51, 0.0  ;;  %v373_v58 = vrot.slane %v372_v48, 1 }
 0x1e5   : > { %v1118_v4 = vadd.f32 %v1117_v31, %v1116_v29  ;;  %v1119_v37 = vsel %vm443_vm7, %v1038_v56, 0.0  ;;  %v389_v31 = vmul.f32 0.16666667, %v339_v9  ;;  %v366_v51 = vrot.slane %v365_v39, 1  ;;  %v1011_v56 = vld [vmem:[%s1918_s23 + $0xa0] sm:$0xff]  ;;  %s1627_s23 = sshra.s32 %s1320_s16, 4  ;;  %s1628_s23 = int_to_ptr.hbm [resolvable:$true] %s1627_s23 }
 0x1e6   : > { %v399_v29 = vpack.c.bf16 %v391_v45, %v391_v45  ;;  %v380_v61 = vrot.slane %v379_v52, 1  ;;  %v374_v6 = vadd.f32 %v373_v58, %v372_v48  ;;  %v388_v13 = vadd.f32 %v387_v0, %v386_v59  ;;  %s1629_s22 = scalar_lea.hbm %s1628_s23, 8  ;;  %p1634_p1 = scmp.lt.s32.totalorder %s1628_s23, %s2122_s5 }
 0x1e7   : > { %v1120_v12 = vadd.f32 %v1119_v37, %v1118_v4  ;;  %v397_v53 = vpack.c.bf16 %v389_v31, %v389_v31  ;;  %v367_v60 = vadd.f32 %v366_v51, %v365_v39  ;;  %v1156_v31 = vpack.c.bf16 %v1994_v36, %v1994_v36  ;;  %p1630_p12 = scmp.ne.s32.totalorder %s1628_s23, %s1629_s22  ;;  %p1635_p2 = scmp.lt.s32.totalorder %s1633_s13, %s1629_s22 }
 0x1e8   : > { %v381_v40 = vadd.f32 %v380_v61, %v379_v52  ;;  %v416_v11 = vunpack.c.l.b16 %v399_v29  ;;  %v394_v5 = vmul.f32 0.16666667, %v374_v6  ;;  %v396_v22 = vmul.f32 0.16666667, %v388_v13 }
 0x1e9   : > { %v1121_v20 = vrot.slane %v1120_v12, 4  ;;  %v414_v63 = vunpack.c.l.b16 %v397_v53  ;;  %v393_v3 = vmul.f32 0.16666667, %v367_v60  ;;  %v1173_v47 = vunpack.c.l.b16 %v1156_v31  ;;  %p1631_p13 = pnand %p1630_p12, %p1747_p5  ;;  %p1636_p3 = por %p1635_p2, %p1634_p1 }
 0x1ea   : > { %v395_v18 = vmul.f32 0.16666667, %v381_v40  ;;  %v402_v17 = vpack.c.bf16 %v394_v5, %v394_v5  ;;  %v404_v32 = vpack.c.bf16 %v396_v22, %v396_v22  ;;  %v1157_v51 = vpack.c.bf16 %v1998_v14, %v1998_v14 }
 0x1eb   : > { %v1122_v43 = vadd.f32 %v1121_v20, %v1120_v12  ;;  %v1107_v12 = vadd.f32 %v1975_v19, %v1105_v30  ;;  %v401_v7 = vpack.c.bf16 %v393_v3, %v393_v3  ;;  %v423_v10 = vsel %vm422_vm9, %v415_v8, %v414_v63  ;;  %p1632_p0 = pneg %p1631_p13 }
 0x1ec   : > { %v1104_v20 = vadd.f32 %v1103_v55, %v1988_v38  ;;  %v403_v27 = vpack.c.bf16 %v395_v18, %v395_v18  ;;  %v425_v19 = vsel %vm424_vm10, %v416_v11, %v423_v10  ;;  %v419_v33 = vunpack.c.l.b16 %v402_v17  ;;  %v301_v18 = vld [vmem:[%s2121_s4 + $0x40] sm:$0xf] }
 0x1ed   : > { %v1123_v46 = vrot.slane %v1122_v43, 2  ;;  %v418_v28 = vunpack.c.l.b16 %v401_v7  ;;  %v1137_v38 = vrot.slane %v1963_v35, 7  ;;  %v427_v39 = vsel %vm426_vm11, %v417_v2, %v425_v19  ;;  %v1487_v7 = vld [vmem:[%s2121_s4 + $0x8] sm:$0xff]  ;;  %p1637_p4 = pnand %p1636_p3, %p1632_p0 }
 0x1ee   : > { %v420_v55 = vunpack.c.l.b16 %v403_v27  ;;  %v421_v45 = vunpack.c.l.b16 %v404_v32  ;;  %v1151_v48 = vmul.f32 %v1135_v25, %v1104_v20  ;;  %v1179_v52 = vrot.slane %v1172_v34, 7  ;;  %v1490_v20 = vld [vmem:[%s2121_s4 + $0x20] sm:$0xff] }
 0x1ef   : > { %v1124_v4 = vadd.f32 %v1123_v46, %v1122_v43  ;;  %v429_v36 = vsel %vm428_vm12, %v418_v28, %v427_v39  ;;  %v1158_v58 = vpack.c.bf16 %v1150_v41, %v1150_v41  ;;  %v1174_v59 = vunpack.c.l.b16 %v1157_v51  ;;  %1235 = vmatpush.bf16.msra.mxu3 %v1490_v20 }
 0x1f0   : > { %v431_v24 = vsel %vm430_vm13, %v419_v33, %v429_v36  ;;  %v1159_v30 = vpack.c.bf16 %v1151_v48, %v1151_v48  ;;  %v1180_v29 = vsel %vm422_vm9, %v1179_v52, %v1171_v54  ;;  %v1136_v14 = vrot.slane %v1963_v35, 6 }
 0x1f1   : > { %v972_v37 = vpop.permute.xlu1 %971  ;;  %v1125_v26 = vrot.slane %v1124_v4, 1  ;;  %v433_v50 = vsel %vm432_vm14, %v420_v55, %v431_v24  ;;  %v1183_v42 = vrot.slane %v1174_v59, 5  ;;  %v302_v10 = vunpack.c.l.bf16 %v301_v18  ;;  %v1491_v55 = vld [vmem:[%s2121_s4 + $0x28] sm:$0xff] }
 0x1f2   : > { %v1035_v9 = vmul.f32 %v1011_v56, %v972_v37  ;;  %v435_v16 = vsel %vm434_vm15, %v421_v45, %v433_v50  ;;  %v1181_v56 = vrot.slane %v1173_v47, 6  ;;  %v1176_v62 = vunpack.c.l.b16 %v1159_v30 }
 0x1f3   : > { %v1126_v46 = vadd.f32 %v1125_v26, %v1124_v4  ;;  %v436_v53 = vpack.c.b16 %v435_v16, %v435_v16  ;;  %v1175_v4 = vunpack.c.l.b16 %v1158_v58  ;;  %v1162_v19 = vperm.slane %v302_v10, 2 }
 0x1f4   : > { %v1108_v15 = vsel %vm443_vm7, %v1035_v9, 0.0  ;;  %v1182_v23 = vsel %vm424_vm10, %v1181_v56, %v1180_v29  ;;  %v1187_v8 = vrot.slane %v1176_v62, 3  ;;  %v462_v45 = vperm.slane %v302_v10, 1 }
 0x1f5   : > { %v1109_v21 = vadd.f32 %v1108_v15, %v1107_v12  ;;  %v1153_v25 = vmul.f32 %v1137_v38, %v1126_v46  ;;  %1431 = vmatmul.msk.bf16.vlgmr.msra.gmra.mxu0 %vm443_vm7, %v436_v53  ;;  %v1184_v0 = vsel %vm426_vm11, %v1183_v42, %v1182_v23  ;;  %v1185_v40 = vrot.slane %v1175_v4, 4  ;;  %v1488_v15 = vld [vmem:[%s2121_s4 + $0x10] sm:$0xff] }
 0x1f6   : > { %485 = vmatpush.bf16.msra.mxu1 %v1488_v15  ;;  %v1492_v38 = vld [vmem:[%s2121_s4 + $0x30] sm:$0xff]  ;;  %v1218_v46 = vperm.slane %v302_v10, 3 }
 0x1f7   : > { %v1110_v43 = vrot.slane %v1109_v21, 4  ;;  %v1161_v61 = vpack.c.bf16 %v1153_v25, %v1153_v25  ;;  %v1186_v3 = vsel %vm428_vm12, %v1185_v40, %v1184_v0  ;;  %1271 = vmatpush.bf16.msrb.mxu0 %v1492_v38 }
 0x1f8   : > { %v1188_v35 = vsel %vm430_vm13, %v1187_v8, %v1186_v3 }
 0x1f9   : > { %v1111_v44 = vadd.f32 %v1110_v43, %v1109_v21  ;;  %v1178_v6 = vunpack.c.l.b16 %v1161_v61  ;;  %v405_v21 = vperm.slane %v302_v10, 0 }
 0x1fa   : > { %486 = vmatpush.bf16.msra.mxu1 %v1487_v7  ;;  %v1244_v24 = vpop.permute.xlu1 %1243 }
 0x1fb   : > { %v1112_v49 = vrot.slane %v1111_v44, 2  ;;  %v1191_v12 = vrot.slane %v1178_v6, 1  ;;  %1272 = vmatpush.bf16.msrb.mxu0 %v1491_v55 }
 0x1fd   : > { %v1113_v1 = vadd.f32 %v1112_v49, %v1111_v44  ;;  %v1493_v44 = vld [vmem:[%s2121_s4 + $0x38] sm:$0xff] }
 0x1fe   : > { %1297 = vmatpush.bf16.msrb.mxu2 %v1493_v44 }
 0x1ff   : > { %v1114_v57 = vrot.slane %v1113_v1, 1 }
 0x201   : > { %v1115_v60 = vadd.f32 %v1114_v57, %v1113_v1  ;;  %v1249_v1 = vperm.slane %v302_v10, 4  ;;  %v1280_v57 = vperm.slane %v302_v10, 5 }
 0x203   : > { %v1152_v63 = vmul.f32 %v1136_v14, %v1115_v60 }
 0x205   : > { %v1160_v37 = vpack.c.bf16 %v1152_v63, %v1152_v63 }
 0x207   : > { %v1177_v9 = vunpack.c.l.b16 %v1160_v37 }
 0x209   : > { %v1189_v11 = vrot.slane %v1177_v9, 2 }
 0x20b   : > { %v1190_v13 = vsel %vm432_vm14, %v1189_v11, %v1188_v35 }
 0x20c   : > { %v1192_v5 = vsel %vm434_vm15, %v1191_v12, %v1190_v13 }
 0x20d   : > { %v1193_v2 = vpack.c.b16 %v1192_v5, %v1192_v5 }
 0x20f   : > { %1462 = vmatmul.msk.bf16.vlgmr.msra.gmra.mxu2 %vm443_vm7, %v1193_v2 }
 0x272   : > { %v456_v22 = vpop.f32.mrf.mxu0 }
 0x273   : > { %v457_v17 = vadd.f32 %v456_v22, %v405_v21 }
 0x275   : > { %v460_v26 = vmax.f32 %v457_v17, 0.0 }
 0x277   : > { %v461_v27 = vpack.c.bf16 %v460_v26, %v460_v26 }
 0x279   : > { %1440 = vmatmul.msk.bf16.vlgmr.msra.gmra.mxu1 %vm475_vm0, %v461_v27 }
 0x27a   : > { %v458_v28 = vpop.f32.mrf.mxu0 }
 0x292   : > { %v1212_v31 = vpop.f32.mrf.mxu2 }
 0x293   : > { %v1213_v43 = vadd.f32 %v1212_v31, %v1162_v19 }
 0x295   : > { %v1216_v32 = vmax.f32 %v1213_v43, 0.0 }
 0x297   : > { %v1217_v33 = vpack.c.bf16 %v1216_v32, %v1216_v32 }
 0x299   : > { %1467 = vmatmul.msk.bf16.vlgmr.msra.gmra.mxu3 %vm443_vm7, %v1217_v33 }
 0x29a   : > { %v1214_v34 = vpop.f32.mrf.mxu2 }
 0x2f6   : > { %v488_v39 = vpop.f32.mrf.mxu1 }
 0x2f7   : > { %v489_v36 = vadd.f32 %v488_v39, %v462_v45 }
 0x2f9   : > { %v492_v47 = vmax.f32 %v489_v36, 0.0 }
 0x2fe   : > { %v490_v41 = vpop.f32.mrf.mxu1 }
 0x31c   : > { %v1237_v48 = vpop.f32.mrf.mxu3 }
 0x31d   : > { %v1238_v49 = vadd.f32 %v1237_v48, %v1218_v46 }
 0x31f   : > { %v1246_v50 = vmul.f32 %v1244_v24, %v1238_v49 }
 0x321   : > { %v1247_v51 = vadd.f32 %v1246_v50, %v492_v47 }
 0x323   : > { %v1248_v52 = vpack.c.bf16 %v1247_v51, %v1247_v51 }
 0x324   : > { %v1239_v16 = vpop.f32.mrf.mxu3 }
 0x325   : > { %1476 = vmatmul.msk.bf16.vlgmr.msrb.gmra.mxu0 %vm475_vm0, %v1248_v52 }
 0x3a2   : > { %v1274_v53 = vpop.f32.mrf.mxu0 }
 0x3a3   : > { %v1275_v54 = vadd.f32 %v1274_v53, %v1249_v1 }
 0x3a5   : > { %v1278_v25 = vmax.f32 %v1275_v54, 0.0 }
 0x3a7   : > { %v1279_v30 = vpack.c.bf16 %v1278_v25, %v1278_v25 }
 0x3a9   : > { %1481 = vmatmul.msk.bf16.vlgmr.msrb.gmra.mxu2 %vm443_vm7, %v1279_v30 }
 0x3aa   : > { %v1276_v56 = vpop.f32.mrf.mxu0 }
 0x42c   : > { %v1299_v58 = vpop.f32.mrf.mxu2 }
 0x42d   : > { %v1300_v59 = vadd.f32 %v1299_v58, %v1280_v57 }
 0x42f   : > { %1303 = vst [vmem:[%s262_s14] sm:$0xff] %v1300_v59 }
 0x430   : > { %1640 = shalt.err (!%p1637_p4)
}
 0x431   : > { %1495 = dma.vmem_to_hbm [thread:$0]  (%p1747_p5), %s1318_s15, 128, %s1320_s16, %s1305_s17  }
 0x434   : > { %v1301_v29 = vpop.f32.mrf.mxu2 }
 0x435 PF: > { %p1501_p7 = scmp.ge.s32.totalorder %s1675_s21, 2  ;;  %s1331_s7 = sand.u32 1, %s1663_s18  }
 0x436   : > { %s1332_s8 = scalar_lea.sflag [#allocation3], %s1331_s7 }
 0x437   : > { %p1498_p8 = pnand %p1501_p7, %p1751_p6 }
 0x439   : > { %p1499_p9 = pneg %p1498_p8 }
 0x43b   : > { %1658 = dma.done.wait (%p1499_p9), %s1332_s8, 128  }
 0x43c   : > { %1660 = vsyncadd (%p1499_p9), %s1332_s8, 4294967168  ;;  %p15_p10 = scmp.ge.s32.totalorder %s1734_s24, 4   ;;  %s2125_s18 = smov %s1667_s19 }
 0x43d   : > { %s2126_s19 = smov %s1671_s20  ;;  %s2127_s20 = smov %s1745_s27 }
 0x43e   : > { %s2128_s21 = smov %s1734_s24  ;;  %17 = sbr.rel (!%p15_p10) target bundleno = 3 (0x3), region = 84 }
 0x443   :  { %1338 = vsyncpa [#allocation3], 1 }
 0x444   :  { %1340 = vsyncpa [#allocation3 + $0x1], 1 }

</bundles_post_ra>
